<compile_context>
chip_gen: v5e
topology: v5e:2x2
jax: 0.10.0
libtpu: 0.0.40
codegen_flags: <defaults>
</compile_context>

<pallas_src>
import numpy as np
import jax
import jax.numpy as jnp
from jax.experimental import pallas as pl
from jax.experimental.pallas import tpu as pltpu

NOISE = 0.125
LANES = 128


def _mls_prng_sequence(n_calls, nbits=4):
    """Replicates chained scipy.signal.max_len_seq(4, state, 1) calls.

    taps for nbits=4 are [3], initial state all-ones, one bit per call with
    the state threaded between calls — exactly the reference's `prng()`.
    Returns 2*bit - 1 in {-1.0, +1.0}. Draw order matches the PyTorch
    argument evaluation order: LUT0 c0..c3, LUT1 c0..c3, LUT2 c0..c3.
    """
    taps = [3]
    state = [1] * nbits
    out = []
    for _ in range(n_calls):
        bit = state[0]
        fb = bit
        for t in taps:
            fb ^= state[t % nbits]
        state[0] = fb
        state = state[1:] + state[:1]          # np.roll(state, -1)
        out.append(2.0 * bit - 1.0)
    return np.array(out, dtype=np.float32)


def triangle_kernel(w_ref, pn_ref, x0_ref, x1_ref, x2_ref,
                    y0_ref, y1_ref, y2_ref):
    # w_ref:  (3, 4) SMEM — LUT2 weights.
    # pn_ref: (3, 4) SMEM — prng() * noise, folded host-side (numpy).
    # x*_ref: (16, 128) VMEM inputs; y*_ref: (16, 128) VMEM outputs.

    # Candidates c_lk = w_lk + |1 - |w_lk|| * pn_lk : 12 scalar abs/FMA ops
    # riding the scalar unit — free filler for this overhead-bound call.
    c = [[w_ref[l, k] + jnp.abs(1.0 - jnp.abs(w_ref[l, k])) * pn_ref[l, k]
          for k in range(4)] for l in range(3)]

    # Sign predicates computed once, reused by all three LUTs.
    s0 = x0_ref[...] > 0
    s1 = x1_ref[...] > 0
    s2 = x2_ref[...] > 0

    def lut2(l, sa, sb):
        # Mux(s, p, q) == q if s > 0 else p  ->  jnp.where(s, q, p).
        lo = jnp.where(sa, c[l][1], c[l][0])   # Mux(a, c0, c1)
        hi = jnp.where(sa, c[l][3], c[l][2])   # Mux(a, c2, c3)
        return jnp.where(sb, hi, lo)           # Mux(b, lo, hi)

    y0_ref[...] = lut2(0, s1, s2)   # self.luts[0](x1, x2)
    y1_ref[...] = lut2(1, s0, s2)   # self.luts[1](x0, x2)
    y2_ref[...] = lut2(2, s0, s1)   # self.luts[2](x0, x1)


def triangle_forward(x0, x1, x2, weights, prng_noise):
    """x0/x1/x2: same arbitrary shape; weights, prng_noise: (3, 4) float32."""
    orig_shape = x0.shape
    total = int(np.prod(orig_shape))
    assert total % LANES == 0, "input size must be a multiple of 128 lanes"
    M, N = total // LANES, LANES                 # (2,4,16,16) -> (16,128)

    # Contiguous reshape = free bitcast; keeps each operand lane-dense.
    x0f = x0.reshape(M, N).astype(jnp.float32)
    x1f = x1.reshape(M, N).astype(jnp.float32)
    x2f = x2.reshape(M, N).astype(jnp.float32)

    vmem = pl.BlockSpec(memory_space=pltpu.MemorySpace.VMEM)
    smem = pl.BlockSpec(memory_space=pltpu.MemorySpace.SMEM)
    out_sds = jax.ShapeDtypeStruct((M, N), jnp.float32)

    y0, y1, y2 = pl.pallas_call(
        triangle_kernel,
        out_shape=(out_sds, out_sds, out_sds),
        in_specs=[smem, smem, vmem, vmem, vmem],
        out_specs=(vmem, vmem, vmem),
        cost_estimate=pl.CostEstimate(
            flops=12 * M * N,                    # 3 compares + 9 selects (rough)
            transcendentals=0,
            bytes_accessed=6 * M * N * 4),       # 3 in + 3 out, f32
    )(weights.astype(jnp.float32), prng_noise.astype(jnp.float32),
      x0f, x1f, x2f)

    return [y0.reshape(orig_shape), y1.reshape(orig_shape),
            y2.reshape(orig_shape)]


if __name__ == "__main__":
    key = jax.random.PRNGKey(0)
    k0, k1, k2 = jax.random.split(key, 3)
    shape = (2, 4, 16, 16)
    x0 = jax.random.normal(k0, shape, dtype=jnp.float32)
    x1 = jax.random.normal(k1, shape, dtype=jnp.float32)
    x2 = jax.random.normal(k2, shape, dtype=jnp.float32)

    # LUT2 parameters: nn.Parameter(torch.zeros(4)) for each of the 3 LUTs.
    weights = jnp.zeros((3, 4), dtype=jnp.float32)
    # 12 prng() draws per forward (4 per LUT, LUTs in order 0,1,2), folded
    # with `noise` host-side in numpy (no XLA op).
    prng_noise = jnp.asarray(_mls_prng_sequence(12).reshape(3, 4) * NOISE)

    outs = triangle_forward(x0, x1, x2, weights, prng_noise)
    for o in outs:
        jax.block_until_ready(o)

    # Pure-JAX reference check (same formulas, no Pallas).
    def ref_lut(l, a, b):
        c = [weights[l, k] + jnp.abs(1.0 - jnp.abs(weights[l, k]))
             * prng_noise[l, k] for k in range(4)]
        inner_lo = jnp.where(a > 0, c[1], c[0])
        inner_hi = jnp.where(a > 0, c[3], c[2])
        return jnp.where(b > 0, inner_hi, inner_lo)

    refs = [ref_lut(0, x1, x2), ref_lut(1, x0, x2), ref_lut(2, x0, x1)]
    for o, r in zip(outs, refs):
        np.testing.assert_allclose(np.asarray(o), np.asarray(r),
                                   rtol=1e-6, atol=1e-6)

    print("KERNEL_OK")
</pallas_src>

<mosaic_0001>
module attributes {stable_mosaic.version = 11 : i64} {
  func.func @triangle_kernel(%arg0: memref<3x4xf32, #tpu.memory_space<smem>>, %arg1: memref<3x4xf32, #tpu.memory_space<smem>>, %arg2: memref<16x128xf32, #tpu.memory_space<vmem>>, %arg3: memref<16x128xf32, #tpu.memory_space<vmem>>, %arg4: memref<16x128xf32, #tpu.memory_space<vmem>>, %arg5: memref<16x128xf32, #tpu.memory_space<vmem>>, %arg6: memref<16x128xf32, #tpu.memory_space<vmem>>, %arg7: memref<16x128xf32, #tpu.memory_space<vmem>>) attributes {dimension_semantics = [], scalar_prefetch = 0 : i64, scratch_operands = 0 : i64, tpu.core_type = #tpu.core_type<tc>} {
    %c0 = arith.constant 0 : index
    %c0_0 = arith.constant 0 : index
    %0 = memref.load %arg0[%c0, %c0_0] : memref<3x4xf32, #tpu.memory_space<smem>>
    %c0_1 = arith.constant 0 : index
    %c0_2 = arith.constant 0 : index
    %1 = memref.load %arg0[%c0_1, %c0_2] : memref<3x4xf32, #tpu.memory_space<smem>>
    %2 = math.absf %1 : f32
    %cst = arith.constant 1.000000e+00 : f32
    %3 = arith.subf %cst, %2 : f32
    %4 = math.absf %3 : f32
    %c0_3 = arith.constant 0 : index
    %c0_4 = arith.constant 0 : index
    %5 = memref.load %arg1[%c0_3, %c0_4] : memref<3x4xf32, #tpu.memory_space<smem>>
    %6 = arith.mulf %4, %5 : f32
    %7 = arith.addf %0, %6 : f32
    %c0_5 = arith.constant 0 : index
    %c1 = arith.constant 1 : index
    %8 = memref.load %arg0[%c0_5, %c1] : memref<3x4xf32, #tpu.memory_space<smem>>
    %c0_6 = arith.constant 0 : index
    %c1_7 = arith.constant 1 : index
    %9 = memref.load %arg0[%c0_6, %c1_7] : memref<3x4xf32, #tpu.memory_space<smem>>
    %10 = math.absf %9 : f32
    %cst_8 = arith.constant 1.000000e+00 : f32
    %11 = arith.subf %cst_8, %10 : f32
    %12 = math.absf %11 : f32
    %c0_9 = arith.constant 0 : index
    %c1_10 = arith.constant 1 : index
    %13 = memref.load %arg1[%c0_9, %c1_10] : memref<3x4xf32, #tpu.memory_space<smem>>
    %14 = arith.mulf %12, %13 : f32
    %15 = arith.addf %8, %14 : f32
    %c0_11 = arith.constant 0 : index
    %c2 = arith.constant 2 : index
    %16 = memref.load %arg0[%c0_11, %c2] : memref<3x4xf32, #tpu.memory_space<smem>>
    %c0_12 = arith.constant 0 : index
    %c2_13 = arith.constant 2 : index
    %17 = memref.load %arg0[%c0_12, %c2_13] : memref<3x4xf32, #tpu.memory_space<smem>>
    %18 = math.absf %17 : f32
    %cst_14 = arith.constant 1.000000e+00 : f32
    %19 = arith.subf %cst_14, %18 : f32
    %20 = math.absf %19 : f32
    %c0_15 = arith.constant 0 : index
    %c2_16 = arith.constant 2 : index
    %21 = memref.load %arg1[%c0_15, %c2_16] : memref<3x4xf32, #tpu.memory_space<smem>>
    %22 = arith.mulf %20, %21 : f32
    %23 = arith.addf %16, %22 : f32
    %c0_17 = arith.constant 0 : index
    %c3 = arith.constant 3 : index
    %24 = memref.load %arg0[%c0_17, %c3] : memref<3x4xf32, #tpu.memory_space<smem>>
    %c0_18 = arith.constant 0 : index
    %c3_19 = arith.constant 3 : index
    %25 = memref.load %arg0[%c0_18, %c3_19] : memref<3x4xf32, #tpu.memory_space<smem>>
    %26 = math.absf %25 : f32
    %cst_20 = arith.constant 1.000000e+00 : f32
    %27 = arith.subf %cst_20, %26 : f32
    %28 = math.absf %27 : f32
    %c0_21 = arith.constant 0 : index
    %c3_22 = arith.constant 3 : index
    %29 = memref.load %arg1[%c0_21, %c3_22] : memref<3x4xf32, #tpu.memory_space<smem>>
    %30 = arith.mulf %28, %29 : f32
    %31 = arith.addf %24, %30 : f32
    %c1_23 = arith.constant 1 : index
    %c0_24 = arith.constant 0 : index
    %32 = memref.load %arg0[%c1_23, %c0_24] : memref<3x4xf32, #tpu.memory_space<smem>>
    %c1_25 = arith.constant 1 : index
    %c0_26 = arith.constant 0 : index
    %33 = memref.load %arg0[%c1_25, %c0_26] : memref<3x4xf32, #tpu.memory_space<smem>>
    %34 = math.absf %33 : f32
    %cst_27 = arith.constant 1.000000e+00 : f32
    %35 = arith.subf %cst_27, %34 : f32
    %36 = math.absf %35 : f32
    %c1_28 = arith.constant 1 : index
    %c0_29 = arith.constant 0 : index
    %37 = memref.load %arg1[%c1_28, %c0_29] : memref<3x4xf32, #tpu.memory_space<smem>>
    %38 = arith.mulf %36, %37 : f32
    %39 = arith.addf %32, %38 : f32
    %c1_30 = arith.constant 1 : index
    %c1_31 = arith.constant 1 : index
    %40 = memref.load %arg0[%c1_30, %c1_31] : memref<3x4xf32, #tpu.memory_space<smem>>
    %c1_32 = arith.constant 1 : index
    %c1_33 = arith.constant 1 : index
    %41 = memref.load %arg0[%c1_32, %c1_33] : memref<3x4xf32, #tpu.memory_space<smem>>
    %42 = math.absf %41 : f32
    %cst_34 = arith.constant 1.000000e+00 : f32
    %43 = arith.subf %cst_34, %42 : f32
    %44 = math.absf %43 : f32
    %c1_35 = arith.constant 1 : index
    %c1_36 = arith.constant 1 : index
    %45 = memref.load %arg1[%c1_35, %c1_36] : memref<3x4xf32, #tpu.memory_space<smem>>
    %46 = arith.mulf %44, %45 : f32
    %47 = arith.addf %40, %46 : f32
    %c1_37 = arith.constant 1 : index
    %c2_38 = arith.constant 2 : index
    %48 = memref.load %arg0[%c1_37, %c2_38] : memref<3x4xf32, #tpu.memory_space<smem>>
    %c1_39 = arith.constant 1 : index
    %c2_40 = arith.constant 2 : index
    %49 = memref.load %arg0[%c1_39, %c2_40] : memref<3x4xf32, #tpu.memory_space<smem>>
    %50 = math.absf %49 : f32
    %cst_41 = arith.constant 1.000000e+00 : f32
    %51 = arith.subf %cst_41, %50 : f32
    %52 = math.absf %51 : f32
    %c1_42 = arith.constant 1 : index
    %c2_43 = arith.constant 2 : index
    %53 = memref.load %arg1[%c1_42, %c2_43] : memref<3x4xf32, #tpu.memory_space<smem>>
    %54 = arith.mulf %52, %53 : f32
    %55 = arith.addf %48, %54 : f32
    %c1_44 = arith.constant 1 : index
    %c3_45 = arith.constant 3 : index
    %56 = memref.load %arg0[%c1_44, %c3_45] : memref<3x4xf32, #tpu.memory_space<smem>>
    %c1_46 = arith.constant 1 : index
    %c3_47 = arith.constant 3 : index
    %57 = memref.load %arg0[%c1_46, %c3_47] : memref<3x4xf32, #tpu.memory_space<smem>>
    %58 = math.absf %57 : f32
    %cst_48 = arith.constant 1.000000e+00 : f32
    %59 = arith.subf %cst_48, %58 : f32
    %60 = math.absf %59 : f32
    %c1_49 = arith.constant 1 : index
    %c3_50 = arith.constant 3 : index
    %61 = memref.load %arg1[%c1_49, %c3_50] : memref<3x4xf32, #tpu.memory_space<smem>>
    %62 = arith.mulf %60, %61 : f32
    %63 = arith.addf %56, %62 : f32
    %c2_51 = arith.constant 2 : index
    %c0_52 = arith.constant 0 : index
    %64 = memref.load %arg0[%c2_51, %c0_52] : memref<3x4xf32, #tpu.memory_space<smem>>
    %c2_53 = arith.constant 2 : index
    %c0_54 = arith.constant 0 : index
    %65 = memref.load %arg0[%c2_53, %c0_54] : memref<3x4xf32, #tpu.memory_space<smem>>
    %66 = math.absf %65 : f32
    %cst_55 = arith.constant 1.000000e+00 : f32
    %67 = arith.subf %cst_55, %66 : f32
    %68 = math.absf %67 : f32
    %c2_56 = arith.constant 2 : index
    %c0_57 = arith.constant 0 : index
    %69 = memref.load %arg1[%c2_56, %c0_57] : memref<3x4xf32, #tpu.memory_space<smem>>
    %70 = arith.mulf %68, %69 : f32
    %71 = arith.addf %64, %70 : f32
    %c2_58 = arith.constant 2 : index
    %c1_59 = arith.constant 1 : index
    %72 = memref.load %arg0[%c2_58, %c1_59] : memref<3x4xf32, #tpu.memory_space<smem>>
    %c2_60 = arith.constant 2 : index
    %c1_61 = arith.constant 1 : index
    %73 = memref.load %arg0[%c2_60, %c1_61] : memref<3x4xf32, #tpu.memory_space<smem>>
    %74 = math.absf %73 : f32
    %cst_62 = arith.constant 1.000000e+00 : f32
    %75 = arith.subf %cst_62, %74 : f32
    %76 = math.absf %75 : f32
    %c2_63 = arith.constant 2 : index
    %c1_64 = arith.constant 1 : index
    %77 = memref.load %arg1[%c2_63, %c1_64] : memref<3x4xf32, #tpu.memory_space<smem>>
    %78 = arith.mulf %76, %77 : f32
    %79 = arith.addf %72, %78 : f32
    %c2_65 = arith.constant 2 : index
    %c2_66 = arith.constant 2 : index
    %80 = memref.load %arg0[%c2_65, %c2_66] : memref<3x4xf32, #tpu.memory_space<smem>>
    %c2_67 = arith.constant 2 : index
    %c2_68 = arith.constant 2 : index
    %81 = memref.load %arg0[%c2_67, %c2_68] : memref<3x4xf32, #tpu.memory_space<smem>>
    %82 = math.absf %81 : f32
    %cst_69 = arith.constant 1.000000e+00 : f32
    %83 = arith.subf %cst_69, %82 : f32
    %84 = math.absf %83 : f32
    %c2_70 = arith.constant 2 : index
    %c2_71 = arith.constant 2 : index
    %85 = memref.load %arg1[%c2_70, %c2_71] : memref<3x4xf32, #tpu.memory_space<smem>>
    %86 = arith.mulf %84, %85 : f32
    %87 = arith.addf %80, %86 : f32
    %c2_72 = arith.constant 2 : index
    %c3_73 = arith.constant 3 : index
    %88 = memref.load %arg0[%c2_72, %c3_73] : memref<3x4xf32, #tpu.memory_space<smem>>
    %c2_74 = arith.constant 2 : index
    %c3_75 = arith.constant 3 : index
    %89 = memref.load %arg0[%c2_74, %c3_75] : memref<3x4xf32, #tpu.memory_space<smem>>
    %90 = math.absf %89 : f32
    %cst_76 = arith.constant 1.000000e+00 : f32
    %91 = arith.subf %cst_76, %90 : f32
    %92 = math.absf %91 : f32
    %c2_77 = arith.constant 2 : index
    %c3_78 = arith.constant 3 : index
    %93 = memref.load %arg1[%c2_77, %c3_78] : memref<3x4xf32, #tpu.memory_space<smem>>
    %94 = arith.mulf %92, %93 : f32
    %95 = arith.addf %88, %94 : f32
    %c0_79 = arith.constant 0 : index
    %c0_80 = arith.constant 0 : index
    %96 = vector.load %arg2[%c0_79, %c0_80] : memref<16x128xf32, #tpu.memory_space<vmem>>, vector<16x128xf32>
    %cst_81 = arith.constant 0.000000e+00 : f32
    %97 = vector.broadcast %cst_81 : f32 to vector<16x128xf32>
    %98 = arith.cmpf ogt, %96, %97 : vector<16x128xf32>
    %c0_82 = arith.constant 0 : index
    %c0_83 = arith.constant 0 : index
    %99 = vector.load %arg3[%c0_82, %c0_83] : memref<16x128xf32, #tpu.memory_space<vmem>>, vector<16x128xf32>
    %cst_84 = arith.constant 0.000000e+00 : f32
    %100 = vector.broadcast %cst_84 : f32 to vector<16x128xf32>
    %101 = arith.cmpf ogt, %99, %100 : vector<16x128xf32>
    %c0_85 = arith.constant 0 : index
    %c0_86 = arith.constant 0 : index
    %102 = vector.load %arg4[%c0_85, %c0_86] : memref<16x128xf32, #tpu.memory_space<vmem>>, vector<16x128xf32>
    %cst_87 = arith.constant 0.000000e+00 : f32
    %103 = vector.broadcast %cst_87 : f32 to vector<16x128xf32>
    %104 = arith.cmpf ogt, %102, %103 : vector<16x128xf32>
    %105 = vector.broadcast %15 : f32 to vector<16x128xf32>
    %106 = vector.broadcast %7 : f32 to vector<16x128xf32>
    %107 = arith.select %101, %105, %106 : vector<16x128xi1>, vector<16x128xf32>
    %108 = vector.broadcast %31 : f32 to vector<16x128xf32>
    %109 = vector.broadcast %23 : f32 to vector<16x128xf32>
    %110 = arith.select %101, %108, %109 : vector<16x128xi1>, vector<16x128xf32>
    %111 = arith.select %104, %110, %107 : vector<16x128xi1>, vector<16x128xf32>
    %c0_88 = arith.constant 0 : index
    %c0_89 = arith.constant 0 : index
    %112 = vector.load %arg5[%c0_88, %c0_89] : memref<16x128xf32, #tpu.memory_space<vmem>>, vector<16x128xf32>
    tpu.vector_store %arg5[%c0_88, %c0_89], %111 {strides = array<i32>} : memref<16x128xf32, #tpu.memory_space<vmem>>, vector<16x128xf32>,
    %113 = vector.broadcast %47 : f32 to vector<16x128xf32>
    %114 = vector.broadcast %39 : f32 to vector<16x128xf32>
    %115 = arith.select %98, %113, %114 : vector<16x128xi1>, vector<16x128xf32>
    %116 = vector.broadcast %63 : f32 to vector<16x128xf32>
    %117 = vector.broadcast %55 : f32 to vector<16x128xf32>
    %118 = arith.select %98, %116, %117 : vector<16x128xi1>, vector<16x128xf32>
    %119 = arith.select %104, %118, %115 : vector<16x128xi1>, vector<16x128xf32>
    %c0_90 = arith.constant 0 : index
    %c0_91 = arith.constant 0 : index
    %120 = vector.load %arg6[%c0_90, %c0_91] : memref<16x128xf32, #tpu.memory_space<vmem>>, vector<16x128xf32>
    tpu.vector_store %arg6[%c0_90, %c0_91], %119 {strides = array<i32>} : memref<16x128xf32, #tpu.memory_space<vmem>>, vector<16x128xf32>,
    %121 = vector.broadcast %79 : f32 to vector<16x128xf32>
    %122 = vector.broadcast %71 : f32 to vector<16x128xf32>
    %123 = arith.select %98, %121, %122 : vector<16x128xi1>, vector<16x128xf32>
    %124 = vector.broadcast %95 : f32 to vector<16x128xf32>
    %125 = vector.broadcast %87 : f32 to vector<16x128xf32>
    %126 = arith.select %98, %124, %125 : vector<16x128xi1>, vector<16x128xf32>
    %127 = arith.select %101, %126, %123 : vector<16x128xi1>, vector<16x128xf32>
    %c0_92 = arith.constant 0 : index
    %c0_93 = arith.constant 0 : index
    %128 = vector.load %arg7[%c0_92, %c0_93] : memref<16x128xf32, #tpu.memory_space<vmem>>, vector<16x128xf32>
    tpu.vector_store %arg7[%c0_92, %c0_93], %127 {strides = array<i32>} : memref<16x128xf32, #tpu.memory_space<vmem>>, vector<16x128xf32>,
    return
  }
}

</mosaic_0001>

<bundles_post_ra>
// kernel: tpu_custom_call.1
= control target key start
LH: loop header
LB: loop body
LE: loop exit
PB: predicated region body
PF: predicated region fallthrough
CT: control target
= control target key end

     0   :  { %13 = vsyncpa [#allocation5], 0  ;;  %s700_s0 = inlined_call_operand.hbm [shape: f32[3,4], index: 0, kind: input, shape index: {}]   ;;  %s701_s1 = inlined_call_operand.hbm [shape: f32[3,4], index: 1, kind: input, shape index: {}]   ;;  %s702_s2 = inlined_call_operand.hbm [shape: f32[16,128], index: 2, kind: input, shape index: {}]   ;;  %s703_s3 = inlined_call_operand.hbm [shape: f32[16,128], index: 3, kind: input, shape index: {}]   ;;  %s704_s4 = inlined_call_operand.hbm [shape: f32[16,128], index: 4, kind: input, shape index: {}]   ;;  %s705_s5 = inlined_call_operand.hbm [shape: f32[16,128], index: 5, kind: output, shape index: {0}]   ;;  %s706_s6 = inlined_call_operand.hbm [shape: f32[16,128], index: 6, kind: output, shape index: {1}]   ;;  %s707_s7 = inlined_call_operand.hbm [shape: f32[16,128], index: 7, kind: output, shape index: {2}]  }
   0x1   :  { %14 = vsyncpa [#allocation7], 0 }
   0x2   :  { %15 = vsyncpa [#allocation3], 0 }
   0x3   :  { %16 = vsyncpa [#allocation10], 0 }
   0x4   :  { %17 = vsyncpa [#allocation4], 0 }
   0x5   :  { %18 = vsyncpa [#allocation14], 0  ;;  %s54_s26 = sshll.u32 %s703_s3, 4  ;;  %s498_s27 = smov [#allocation9]   ;;  %s55_s26 = int_to_ptr.hbm [resolvable:$true] %s54_s26 }
   0x6   :  { %s56_s28 = sshll.u32 %s498_s27, 4  ;;  %s24_s8 = sshll.u32 %s700_s0, 4  ;;  %s57_s28 = int_to_ptr.vmem [resolvable:$true] %s56_s28  ;;  %s25_s8 = int_to_ptr.hbm [resolvable:$true] %s24_s8 }
   0x7   :  { %s499_s9 = smov 128   ;;  %s500_s10 = smov 8  }
   0x8   :  { %62 = dma.hbm_to_vmem [thread:$0]  %s55_s26, 256, %s57_s28, [#allocation10], %s499_s9, %s499_s9, %s500_s10  }
   0x9   :  { %s501_s11 = smov [#allocation2]   ;;  %s33_s3 = sshll.u32 %s701_s1, 4  ;;  %s34_s3 = int_to_ptr.hbm [resolvable:$true] %s33_s3 }
   0xa   :  { %27 = dma.hbm_to_smem %s25_s8, 64, %s501_s11, [#allocation5]  }
   0xb   :  { %s41_s16 = sshll.u32 %s702_s2, 4  ;;  %s502_s17 = smov [#allocation6]   ;;  %s42_s16 = int_to_ptr.hbm [resolvable:$true] %s41_s16 }
   0xc   :  { %36 = dma.hbm_to_smem %s34_s3, 64, %s502_s17, [#allocation7]  }
   0xd   :  { %s503_s0 = smov [#allocation8]   ;;  %s67_s21 = sshll.u32 %s704_s4, 4  ;;  %s68_s21 = int_to_ptr.hbm [resolvable:$true] %s67_s21 }
   0xe   :  { %s43_s18 = sshll.u32 %s503_s0, 4  ;;  %s504_s1 = smov [#allocation11]   ;;  %s44_s18 = int_to_ptr.vmem [resolvable:$true] %s43_s18 }
   0xf   :  { %49 = dma.hbm_to_vmem [thread:$0]  %s42_s16, 256, %s44_s18, [#allocation3], %s499_s9, %s499_s9, %s500_s10  }
  0x10   :  { %s69_s22 = sshll.u32 %s504_s1, 4  ;;  %s70_s22 = int_to_ptr.vmem [resolvable:$true] %s69_s22 }
  0x11   :  { %75 = dma.hbm_to_vmem [thread:$0]  %s68_s21, 256, %s70_s22, [#allocation10], %s499_s9, %s499_s9, %s500_s10  }
  0x12   :  { %486 = dma.done.wait [#allocation5], 64  }
  0x13   :  { %487 = vsyncadd [#allocation5], 4294967232 }
  0x14   :  { %488 = dma.done.wait [#allocation7], 64  }
  0x15   :  { %489 = vsyncadd [#allocation7], 4294967232 }
  0x16   :  { %490 = dma.done.wait [#allocation3], 256  }
  0x17   :  { %491 = vsyncadd [#allocation3], 4294967040 }
  0x18   :  { %492 = dma.done.wait [#allocation10], 512  }
  0x19   :  { %493 = vsyncadd [#allocation10], 4294966784 }
  0x1a   :  { %96 = sfence }
  0x1b   :  { %s572_s2 = sld [smem:[#allocation2 + $0x80]]  ;;  %v586_v0 = vld [vmem:[#allocation8] sm:$0xff]  ;;  %v588_v1 = vld [vmem:[#allocation8 + $0x8] sm:$0xff]  ;;  %v626_v14 = vld [vmem:[#allocation9] sm:$0xff] }
  0x1c   :  { %s293_s4 = sld [smem:[#allocation6 + $0x80]]  ;;  %vm183_vm0 = vcmp.gt.f32.partialorder %v586_v0, 0.0  ;;  %v594_v2 = vld [vmem:[#allocation11] sm:$0xff]  ;;  %vm184_vm1 = vcmp.gt.f32.partialorder %v588_v1, 0.0  ;;  %v597_v5 = vld [vmem:[#allocation11 + $0x8] sm:$0xff]  ;;  %v628_v15 = vld [vmem:[#allocation9 + $0x8] sm:$0xff] }
  0x1d   :  { %s574_s23 = sld [smem:[#allocation2 + $0x81]]  ;;  %vm191_vm2 = vcmp.gt.f32.partialorder %v594_v2, 0.0  ;;  %vm192_vm3 = vcmp.gt.f32.partialorder %v597_v5, 0.0  ;;  %vm187_vm4 = vcmp.gt.f32.partialorder %v626_v14, 0.0  ;;  %vm188_vm5 = vcmp.gt.f32.partialorder %v628_v15, 0.0 }
  0x1e   :  { %s295_s24 = sld [smem:[#allocation6 + $0x81]] }
  0x1f   :  { %s576_s25 = sld [smem:[#allocation2 + $0x82]] }
  0x20   :  { %s297_s26 = sld [smem:[#allocation6 + $0x82]] }
  0x21   :  { %s126_s27 = sand.u32 2147483647, %s572_s2  ;;  %s579_s28 = sld [smem:[#allocation2 + $0x83]] }
  0x22   :  { %s127_s29 = ssub.f32 1.0, %s126_s27 }
  0x23   :  { %s133_s30 = sand.u32 2147483647, %s574_s23  ;;  %s299_s8 = sld [smem:[#allocation6 + $0x83]] }
  0x24   :  { %s128_s11 = sand.u32 2147483647, %s127_s29  ;;  %s134_s12 = ssub.f32 1.0, %s133_s30 }
  0x25   :  { %s130_s13 = smul.f32 %s293_s4, %s128_s11  ;;  %s140_s3 = sand.u32 2147483647, %s576_s25 }
  0x26   :  { %s135_s14 = sand.u32 2147483647, %s134_s12  ;;  %s141_s15 = ssub.f32 1.0, %s140_s3 }
  0x27   :  { %s131_s16 = sadd.f32 %s572_s2, %s130_s13  ;;  %s137_s17 = smul.f32 %s295_s24, %s135_s14 }
  0x28   :  { %s142_s0 = sand.u32 2147483647, %s141_s15  ;;  %s147_s18 = sand.u32 2147483647, %s579_s28 }
  0x29   :  { %s138_s19 = sadd.f32 %s574_s23, %s137_s17  ;;  %s144_s20 = smul.f32 %s297_s26, %s142_s0  ;;  %v206_v4 = vstv %s131_s16 }
  0x2a   :  { %s148_s21 = ssub.f32 1.0, %s147_s18 }
  0x2b   :  { %s145_s1 = sadd.f32 %s576_s25, %s144_s20  ;;  %v205_v3 = vstv %s138_s19 }
  0x2c   :  { %s149_s22 = sand.u32 2147483647, %s148_s21  ;;  %s591_s27 = sld [smem:[#allocation2]]  ;;  %v207_v7 = vsel %vm183_vm0, %v205_v3, %v206_v4  ;;  %v208_v8 = vsel %vm184_vm1, %v205_v3, %v206_v4 }
  0x2d   :  { %s151_s4 = smul.f32 %s299_s8, %s149_s22  ;;  %s101_s2 = sld [smem:[#allocation6]]  ;;  %v210_v6 = vstv %s145_s1 }
  0x2e   :  { %s599_s23 = sld [smem:[#allocation2 + $0x1]] }
  0x2f   :  { %s152_s24 = sadd.f32 %s579_s28, %s151_s4 }
  0x30   :  { %s287_s25 = sld [smem:[#allocation6 + $0x1]] }
  0x31   :  { %v209_v9 = vstv %s152_s24  ;;  %s608_s26 = sld [smem:[#allocation2 + $0x2]] }
  0x32   :  { %v211_v10 = vsel %vm183_vm0, %v209_v9, %v210_v6  ;;  %v212_v11 = vsel %vm184_vm1, %v209_v9, %v210_v6  ;;  %s98_s28 = sand.u32 2147483647, %s591_s27  ;;  %s289_s29 = sld [smem:[#allocation6 + $0x2]] }
  0x33   :  { %v213_v12 = vsel %vm191_vm2, %v211_v10, %v207_v7  ;;  %v214_v13 = vsel %vm192_vm3, %v212_v11, %v208_v8  ;;  %s99_s30 = ssub.f32 1.0, %s98_s28 }
  0x34   :  { %215 = vst [vmem:[#allocation13] sm:$0xff] %v213_v12  ;;  %s105_s8 = sand.u32 2147483647, %s599_s23  ;;  %s620_s11 = sld [smem:[#allocation2 + $0x3]] }
  0x35   :  { %216 = vst [vmem:[#allocation13 + $0x8] sm:$0xff] %v214_v13  ;;  %s100_s12 = sand.u32 2147483647, %s99_s30  ;;  %s106_s13 = ssub.f32 1.0, %s105_s8 }
  0x36   :  { %s102_s3 = smul.f32 %s101_s2, %s100_s12  ;;  %s291_s14 = sld [smem:[#allocation6 + $0x3]] }
  0x37   :  { %s107_s15 = sand.u32 2147483647, %s106_s13  ;;  %s112_s16 = sand.u32 2147483647, %s608_s26 }
  0x38   :  { %s103_s17 = sadd.f32 %s102_s3, %s591_s27  ;;  %s109_s0 = smul.f32 %s287_s25, %s107_s15 }
  0x39   :  { %s113_s18 = ssub.f32 1.0, %s112_s16 }
  0x3a   :  { %s110_s19 = sadd.f32 %s599_s23, %s109_s0  ;;  %s119_s20 = sand.u32 2147483647, %s620_s11  ;;  %v194_v17 = vstv %s103_s17 }
  0x3b   :  { %s114_s21 = sand.u32 2147483647, %s113_s18  ;;  %s120_s1 = ssub.f32 1.0, %s119_s20 }
  0x3c   :  { %s116_s22 = smul.f32 %s289_s29, %s114_s21  ;;  %s630_s4 = sld [smem:[#allocation2 + $0x100]]  ;;  %v193_v16 = vstv %s110_s19 }
  0x3d   :  { %s121_s2 = sand.u32 2147483647, %s120_s1  ;;  %s632_s24 = sld [smem:[#allocation6 + $0x100]]  ;;  %v195_v19 = vsel %vm187_vm4, %v193_v16, %v194_v17  ;;  %v196_v20 = vsel %vm188_vm5, %v193_v16, %v194_v17 }
  0x3e   :  { %s117_s28 = sadd.f32 %s608_s26, %s116_s22  ;;  %s123_s27 = smul.f32 %s291_s14, %s121_s2 }
  0x3f   :  { %s637_s23 = sld [smem:[#allocation2 + $0x101]]  ;;  %s505_s26 = smov [#allocation13]  }
  0x40   :  { %s124_s25 = sadd.f32 %s620_s11, %s123_s27  ;;  %v198_v18 = vstv %s117_s28  ;;  %s644_s30 = sshll.u32 %s505_s26, 4  ;;  %s247_s30 = int_to_ptr.vmem [resolvable:$true] %s644_s30 }
  0x41   :  { %s303_s29 = sld [smem:[#allocation6 + $0x101]]  ;;  %s248_s2 = sshll.u32 %s706_s6, 4  ;;  %s249_s2 = int_to_ptr.hbm [resolvable:$true] %s248_s2 }
  0x42   :  { %v197_v21 = vstv %s124_s25  ;;  %s154_s8 = sand.u32 2147483647, %s630_s4  ;;  %s647_s12 = sld [smem:[#allocation2 + $0x102]] }
  0x43   :  { %v199_v22 = vsel %vm187_vm4, %v197_v21, %v198_v18  ;;  %v200_v23 = vsel %vm188_vm5, %v197_v21, %v198_v18  ;;  %s155_s11 = ssub.f32 1.0, %s154_s8  ;;  %s506_s27 = smov [#allocation12]  }
  0x44   :  { %v201_v24 = vsel %vm191_vm2, %v199_v22, %v195_v19  ;;  %v202_v25 = vsel %vm192_vm3, %v200_v23, %v196_v20  ;;  %s305_s13 = sld [smem:[#allocation6 + $0x102]]  ;;  %s233_s25 = sshll.u32 %s506_s27, 4  ;;  %s234_s25 = int_to_ptr.vmem [resolvable:$true] %s233_s25 }
  0x45   :  { %203 = vst [vmem:[#allocation12] sm:$0xff] %v201_v24  ;;  %s156_s3 = sand.u32 2147483647, %s155_s11  ;;  %s161_s14 = sand.u32 2147483647, %s637_s23 }
  0x46   :  { %204 = vst [vmem:[#allocation12 + $0x8] sm:$0xff] %v202_v25  ;;  %s158_s15 = smul.f32 %s632_s24, %s156_s3  ;;  %s162_s16 = ssub.f32 1.0, %s161_s14 }
  0x47   :  { %s660_s17 = sld [smem:[#allocation2 + $0x103]] }
  0x48   :  { %s159_s0 = sadd.f32 %s630_s4, %s158_s15  ;;  %s163_s18 = sand.u32 2147483647, %s162_s16 }
  0x49   :  { %s165_s19 = smul.f32 %s303_s29, %s163_s18  ;;  %s168_s20 = sand.u32 2147483647, %s647_s12 }
  0x4a   :  { %s169_s21 = ssub.f32 1.0, %s168_s20  ;;  %s235_s29 = sshll.u32 %s705_s5, 4  ;;  %v218_v27 = vstv %s159_s0  ;;  %s236_s29 = int_to_ptr.hbm [resolvable:$true] %s235_s29 }
  0x4b   :  { %s166_s28 = sadd.f32 %s637_s23, %s165_s19  ;;  %s507_s23 = smov [#allocation15]  }
  0x4c   :  { %s170_s26 = sand.u32 2147483647, %s169_s21  ;;  %s307_s24 = sld [smem:[#allocation6 + $0x103]] }
  0x4d   :  { %s172_s8 = smul.f32 %s305_s13, %s170_s26  ;;  %s175_s11 = sand.u32 2147483647, %s660_s17  ;;  %v217_v26 = vstv %s166_s28 }
  0x4e   :  { %s176_s3 = ssub.f32 1.0, %s175_s11  ;;  %s259_s18 = sshll.u32 %s507_s23, 4  ;;  %v219_v29 = vsel %vm183_vm0, %v217_v26, %v218_v27  ;;  %v220_v30 = vsel %vm184_vm1, %v217_v26, %v218_v27  ;;  %s260_s18 = int_to_ptr.vmem [resolvable:$true] %s259_s18 }
  0x4f   :  { %s173_s15 = sadd.f32 %s647_s12, %s172_s8  ;;  %s261_s5 = sshll.u32 %s707_s7, 4  ;;  %s262_s5 = int_to_ptr.hbm [resolvable:$true] %s261_s5 }
  0x50   :  { %s177_s16 = sand.u32 2147483647, %s176_s3 }
  0x51   :  { %254 = dma.vmem_to_hbm [thread:$0]  %s247_s30, 256, %s249_s2, [#allocation14], %s499_s9, %s499_s9, %s500_s10  }
  0x52   :  { %s179_s6 = smul.f32 %s307_s24, %s177_s16  ;;  %v222_v28 = vstv %s173_s15 }
  0x53   :  { %241 = dma.vmem_to_hbm [thread:$0]  %s234_s25, 256, %s236_s29, [#allocation4], %s499_s9, %s499_s9, %s500_s10  }
  0x54   :  { %s180_s13 = sadd.f32 %s660_s17, %s179_s6 }
  0x56   :  { %v221_v31 = vstv %s180_s13 }
  0x57   :  { %v223_v32 = vsel %vm183_vm0, %v221_v31, %v222_v28  ;;  %v224_v33 = vsel %vm184_vm1, %v221_v31, %v222_v28 }
  0x58   :  { %v225_v34 = vsel %vm187_vm4, %v223_v32, %v219_v29  ;;  %v226_v35 = vsel %vm188_vm5, %v224_v33, %v220_v30 }
  0x59   :  { %227 = vst [vmem:[#allocation15] sm:$0xff] %v225_v34 }
  0x5a   :  { %228 = vst [vmem:[#allocation15 + $0x8] sm:$0xff] %v226_v35 }
  0x5b   :  { %267 = dma.vmem_to_hbm [thread:$0]  %s260_s18, 256, %s262_s5, [#allocation14], %s499_s9, %s499_s9, %s500_s10  }
  0x5c   :  { %494 = dma.done.wait [#allocation4], 256  }
  0x5d   :  { %495 = vsyncadd [#allocation4], 4294967040 }
  0x5e   :  { %496 = dma.done.wait [#allocation14], 512  }
  0x5f   :  { %497 = vsyncadd [#allocation14], 4294966784 }
  0x60   :  { %280 = vsyncpa [#allocation3], 1 }
  0x61   :  { %281 = vsyncpa [#allocation10], 1 }
  0x62   :  { %282 = vsyncpa [#allocation4], 1 }
  0x63   :  { %283 = vsyncpa [#allocation14], 1 }
  0x64   :  { %284 = vsyncpa [#allocation5], 1 }
  0x65   :  { %285 = vsyncpa [#allocation7], 1 }

</bundles_post_ra>
